<compile_context>
chip_gen: v5e
topology: v5e:2x2
jax: 0.10.0
libtpu: 0.0.40
codegen_flags: <defaults>
</compile_context>

<pallas_src>
import math

import jax
import jax.numpy as jnp
from jax.experimental import pallas as pl
from jax.experimental.pallas import tpu as pltpu


_VMEM_LIMIT_BYTES = 48 * 1024 * 1024   # safe on v7x (64 MiB/TC), well above v5e/v6e defaults
_TILE_TARGET = 2048                    # points per grid step


def _choose_tile(n, target=_TILE_TARGET):
    """Largest multiple-of-8 divisor of n that is <= target, else the full axis."""
    if n <= target:
        return n
    start = target - (target % 8)
    for t in range(start, 7, -8):
        if n % t == 0:
            return t
    # TODO(synk): for huge N with no multiple-of-8 divisor the untiled fallback can exceed
    # the VMEM budget; padding N to a multiple of 8 in the wrapper would make this robust.
    return n


def _tile_max8(z):
    """Reduce a (TN, C) tile to (8, C) using only elementwise (VPU) maxes when possible."""
    tn, c = z.shape
    if tn % 8 == 0:
        return jnp.max(z.reshape(tn // 8, 8, c), axis=0)
    return jnp.broadcast_to(jnp.max(z, axis=0, keepdims=True), (8, c))


# ----------------------------- Pallas kernels -----------------------------

def _tnet3_trunk_kernel(x_ref, w1_ref, b1_ref, w2_ref, b2_ref, w3_ref, b3_ref,
                        pooled_ref, acc_ref):
    """TNet(k=3) trunk: 3 pointwise layers fused with max over points.
    Final layer's bias+ReLU are deferred past the max (exact: bias const/col, ReLU monotone)."""
    n = pl.program_id(1)

    @pl.when(n == 0)
    def _():
        acc_ref[...] = jnp.full_like(acc_ref, -jnp.inf)

    x = x_ref[0]                                                        # (TN, 3) bf16
    h = jnp.dot(x, w1_ref[...], preferred_element_type=jnp.float32) + b1_ref[...]
    h = jnp.maximum(h, 0.0)
    h = jnp.dot(h.astype(jnp.bfloat16), w2_ref[...],
                preferred_element_type=jnp.float32) + b2_ref[...]
    h = jnp.maximum(h, 0.0)
    z = jnp.dot(h.astype(jnp.bfloat16), w3_ref[...],
                preferred_element_type=jnp.float32)                     # (TN,1024), bias/ReLU deferred
    acc_ref[...] = jnp.maximum(acc_ref[...], _tile_max8(z))

    @pl.when(n == pl.num_programs(1) - 1)
    def _():
        pooled = jnp.max(acc_ref[...], axis=0, keepdims=True) + b3_ref[...]
        pooled_ref[0] = jnp.maximum(pooled, 0.0)


def _conv1_tnet64_kernel(x_ref, w1p_ref, b1_ref,
                         wt1_ref, bt1_ref, wt2_ref, bt2_ref, wt3_ref, bt3_ref,
                         pooled_ref, acc_ref):
    """conv1 (input transform folded into per-batch weight) + TNet(k=64) trunk + max.
    conv1's activation is NOT stored (recomputed in the final kernel)."""
    n = pl.program_id(1)

    @pl.when(n == 0)
    def _():
        acc_ref[...] = jnp.full_like(acc_ref, -jnp.inf)

    x = x_ref[0]                                                        # (TN, 3) bf16
    h1 = jnp.dot(x, w1p_ref[0], preferred_element_type=jnp.float32) + b1_ref[...]
    h1 = jnp.maximum(h1, 0.0).astype(jnp.bfloat16)                      # (TN, 64)

    t = jnp.dot(h1, wt1_ref[...], preferred_element_type=jnp.float32) + bt1_ref[...]
    t = jnp.maximum(t, 0.0)
    t = jnp.dot(t.astype(jnp.bfloat16), wt2_ref[...],
                preferred_element_type=jnp.float32) + bt2_ref[...]
    t = jnp.maximum(t, 0.0)
    z = jnp.dot(t.astype(jnp.bfloat16), wt3_ref[...],
                preferred_element_type=jnp.float32)                     # (TN,1024), bias/ReLU deferred
    acc_ref[...] = jnp.maximum(acc_ref[...], _tile_max8(z))

    @pl.when(n == pl.num_programs(1) - 1)
    def _():
        pooled = jnp.max(acc_ref[...], axis=0, keepdims=True) + bt3_ref[...]
        pooled_ref[0] = jnp.maximum(pooled, 0.0)


def _conv123_max_kernel(x_ref, w1p_ref, b1_ref, w2p_ref, b2_ref, w3_ref, b3_ref,
                        out_ref, acc_ref):
    """conv1 recomputed -> conv2 (feature transform folded) -> conv3 (bn3, no ReLU) + max.
    conv3's bias is deferred past the max; conv1/conv2 bias+ReLU stay in-loop (they feed
    the next layer, not the max)."""
    n = pl.program_id(1)

    @pl.when(n == 0)
    def _():
        acc_ref[...] = jnp.full_like(acc_ref, -jnp.inf)

    x = x_ref[0]                                                        # (TN, 3) bf16
    h1 = jnp.dot(x, w1p_ref[0], preferred_element_type=jnp.float32) + b1_ref[...]
    h1 = jnp.maximum(h1, 0.0).astype(jnp.bfloat16)                      # (TN, 64)
    y = jnp.dot(h1, w2p_ref[0], preferred_element_type=jnp.float32) + b2_ref[...]
    y = jnp.maximum(y, 0.0)                                             # (TN, 128)
    z = jnp.dot(y.astype(jnp.bfloat16), w3_ref[...],
                preferred_element_type=jnp.float32)                     # (TN,1024), bias deferred
    acc_ref[...] = jnp.maximum(acc_ref[...], _tile_max8(z))

    @pl.when(n == pl.num_programs(1) - 1)
    def _():
        out_ref[0] = jnp.max(acc_ref[...], axis=0, keepdims=True) + b3_ref[...]


# ------------------------------ kernel wrappers ------------------------------

_COMPILER_PARAMS = pltpu.CompilerParams(
    dimension_semantics=("parallel", "arbitrary"),   # B parallel (megacore), N is the reduction
    vmem_limit_bytes=_VMEM_LIMIT_BYTES,
)

# NOTE(perf, v7x): the large constant-index weights (wt3 / w3, 128x1024 bf16) could be
# single-buffered via pipeline_mode=pl.Buffered(1) to free ~0.5 MiB of VMEM; omitted for
# portability since the win is marginal at TN<=2048.


def tnet3_trunk_pool(x_bf, c1, c2, c3, tn):
    """x_bf: (B, N, 3) bf16 -> (B, 1024) f32 pooled TNet(k=3) features."""
    B, N, cin = x_bf.shape
    w1, b1 = c1
    w2, b2 = c2
    w3, b3 = c3
    cout = w3.shape[1]
    flops = 2 * B * N * (cin * 64 + 64 * 128 + 128 * cout)
    bytes_acc = (B * N * cin * 2 + (cin * 64 + 64 * 128 + 128 * cout) * 2
                 + (64 + 128 + cout) * 4 + B * cout * 4)
    pooled = pl.pallas_call(
        _tnet3_trunk_kernel,
        out_shape=jax.ShapeDtypeStruct((B, 1, cout), jnp.float32),
        grid=(B, N // tn),
        in_specs=[
            pl.BlockSpec((1, tn, cin), lambda i, j: (i, j, 0)),
            pl.BlockSpec(w1.shape, lambda i, j: (0, 0)),
            pl.BlockSpec(b1.shape, lambda i, j: (0, 0)),
            pl.BlockSpec(w2.shape, lambda i, j: (0, 0)),
            pl.BlockSpec(b2.shape, lambda i, j: (0, 0)),
            pl.BlockSpec(w3.shape, lambda i, j: (0, 0)),
            pl.BlockSpec(b3.shape, lambda i, j: (0, 0)),
        ],
        out_specs=pl.BlockSpec((1, 1, cout), lambda i, j: (i, 0, 0)),
        scratch_shapes=[pltpu.VMEM((8, cout), jnp.float32)],
        compiler_params=_COMPILER_PARAMS,
        cost_estimate=pl.CostEstimate(flops=flops, transcendentals=0,
                                      bytes_accessed=bytes_acc),
    )(x_bf, w1.astype(jnp.bfloat16), b1, w2.astype(jnp.bfloat16), b2,
      w3.astype(jnp.bfloat16), b3)
    return pooled[:, 0, :]


def conv1_tnet64_pool(x_bf, w1p, b1, c1, c2, c3, tn):
    """Returns pooled TNet(k=64) features (B, 1024) f32 (conv1 is folded, not stored)."""
    B, N, cin = x_bf.shape
    wt1, bt1 = c1
    wt2, bt2 = c2
    wt3, bt3 = c3
    cout = wt3.shape[1]           # 1024
    flops = 2 * B * N * (cin * 64 + 64 * 64 + 64 * 128 + 128 * cout)
    bytes_acc = (B * N * cin * 2 + B * cin * 64 * 2
                 + (64 * 64 + 64 * 128 + 128 * cout) * 2
                 + (64 + 64 + 128 + cout) * 4 + B * cout * 4)
    pooled = pl.pallas_call(
        _conv1_tnet64_kernel,
        out_shape=jax.ShapeDtypeStruct((B, 1, cout), jnp.float32),
        grid=(B, N // tn),
        in_specs=[
            pl.BlockSpec((1, tn, cin), lambda i, j: (i, j, 0)),
            pl.BlockSpec((1,) + w1p.shape[1:], lambda i, j: (i, 0, 0)),
            pl.BlockSpec(b1.shape, lambda i, j: (0, 0)),
            pl.BlockSpec(wt1.shape, lambda i, j: (0, 0)),
            pl.BlockSpec(bt1.shape, lambda i, j: (0, 0)),
            pl.BlockSpec(wt2.shape, lambda i, j: (0, 0)),
            pl.BlockSpec(bt2.shape, lambda i, j: (0, 0)),
            pl.BlockSpec(wt3.shape, lambda i, j: (0, 0)),
            pl.BlockSpec(bt3.shape, lambda i, j: (0, 0)),
        ],
        out_specs=pl.BlockSpec((1, 1, cout), lambda i, j: (i, 0, 0)),
        scratch_shapes=[pltpu.VMEM((8, cout), jnp.float32)],
        compiler_params=_COMPILER_PARAMS,
        cost_estimate=pl.CostEstimate(flops=flops, transcendentals=0,
                                      bytes_accessed=bytes_acc),
    )(x_bf, w1p, b1,
      wt1.astype(jnp.bfloat16), bt1,
      wt2.astype(jnp.bfloat16), bt2,
      wt3.astype(jnp.bfloat16), bt3)
    return pooled[:, 0, :]


def conv123_max_pool(x_bf, w1p, b1, w2p, b2, w3, b3, tn):
    """x_bf: (B, N, 3) bf16 -> (B, 1024) f32 global feature (conv1 recomputed in-kernel)."""
    B, N, cin = x_bf.shape
    cout = w3.shape[1]
    flops = 2 * B * N * (cin * 64 + 64 * 128 + 128 * cout)
    bytes_acc = (B * N * cin * 2 + B * (cin * 64 + 64 * 128) * 2
                 + 128 * cout * 2 + (64 + 128 + cout) * 4 + B * cout * 4)
    out = pl.pallas_call(
        _conv123_max_kernel,
        out_shape=jax.ShapeDtypeStruct((B, 1, cout), jnp.float32),
        grid=(B, N // tn),
        in_specs=[
            pl.BlockSpec((1, tn, cin), lambda i, j: (i, j, 0)),
            pl.BlockSpec((1,) + w1p.shape[1:], lambda i, j: (i, 0, 0)),
            pl.BlockSpec(b1.shape, lambda i, j: (0, 0)),
            pl.BlockSpec((1,) + w2p.shape[1:], lambda i, j: (i, 0, 0)),
            pl.BlockSpec(b2.shape, lambda i, j: (0, 0)),
            pl.BlockSpec(w3.shape, lambda i, j: (0, 0)),
            pl.BlockSpec(b3.shape, lambda i, j: (0, 0)),
        ],
        out_specs=pl.BlockSpec((1, 1, cout), lambda i, j: (i, 0, 0)),
        scratch_shapes=[pltpu.VMEM((8, cout), jnp.float32)],
        compiler_params=_COMPILER_PARAMS,
        cost_estimate=pl.CostEstimate(flops=flops, transcendentals=0,
                                      bytes_accessed=bytes_acc),
    )(x_bf, w1p, b1, w2p, b2, w3.astype(jnp.bfloat16), b3)
    return out[:, 0, :]


# ------------------------ parameter setup (plain JAX) ------------------------

def _fold_bn(w, b, gamma, beta, mean, var, eps=1e-5):
    # TODO(synk): BatchNorm reproduced in inference mode (running stats);
    # training-mode batch statistics are not replicated.
    scale = gamma / jnp.sqrt(var + eps)
    w_f = w * scale[None, :]
    b_f = (b - mean[None, :]) * scale[None, :] + beta[None, :]
    return w_f, b_f


def _init_linear(key, cin, cout):
    kw, kb = jax.random.split(key)
    bound = 1.0 / math.sqrt(cin)
    w = jax.random.uniform(kw, (cin, cout), jnp.float32, -bound, bound)
    b = jax.random.uniform(kb, (1, cout), jnp.float32, -bound, bound)
    return w, b


def _init_bn(key, c):
    k1, k2, k3, k4 = jax.random.split(key, 4)
    gamma = 1.0 + 0.1 * jax.random.normal(k1, (c,), jnp.float32)
    beta = 0.1 * jax.random.normal(k2, (c,), jnp.float32)
    mean = 0.1 * jax.random.normal(k3, (c,), jnp.float32)
    var = jax.random.uniform(k4, (c,), jnp.float32, 0.5, 1.5)
    return gamma, beta, mean, var


def _init_bn_linear(key, cin, cout):
    k1, k2 = jax.random.split(key)
    w, b = _init_linear(k1, cin, cout)
    return _fold_bn(w, b, *_init_bn(k2, cout))


def init_tnet_params(key, k):
    keys = jax.random.split(key, 6)
    return {
        "k": k,
        "c1": _init_bn_linear(keys[0], k, 64),
        "c2": _init_bn_linear(keys[1], 64, 128),
        "c3": _init_bn_linear(keys[2], 128, 1024),
        "l1": _init_bn_linear(keys[3], 1024, 512),
        "l2": _init_bn_linear(keys[4], 512, 256),
        "l3": _init_linear(keys[5], 256, k * k),
    }


def init_encoder_params(key):
    keys = jax.random.split(key, 5)
    return {
        "conv1": _init_bn_linear(keys[0], 3, 64),
        "conv2": _init_bn_linear(keys[1], 64, 128),
        "conv3": _init_bn_linear(keys[2], 128, 1024),
        "tnet3": init_tnet_params(keys[3], 3),
        "tnet64": init_tnet_params(keys[4], 64),
    }


# ------------------------------ forward pass ------------------------------

def tnet_head(pooled, p):
    """FC head of a TNet on the pooled (B, 1024) vector -> (B, k, k) transform."""
    k = p["k"]
    l1w, l1b = p["l1"]
    l2w, l2b = p["l2"]
    l3w, l3b = p["l3"]
    g = jnp.maximum(pooled @ l1w + l1b, 0.0)
    g = jnp.maximum(g @ l2w + l2b, 0.0)
    g = g @ l3w + l3b
    g = g + jnp.eye(k, dtype=jnp.float32).reshape(1, k * k)
    return g.reshape(-1, k, k)


def pointnet_encoder(x_bcn, params):
    """x_bcn: (B, 3, N) as in the PyTorch module (NCW). Returns (B, 1024)."""
    x = jnp.transpose(x_bcn, (0, 2, 1)).astype(jnp.float32)       # (B, N, 3)
    B, N, _ = x.shape
    tn = _choose_tile(N)
    x_bf = x.astype(jnp.bfloat16)

    # Input-transform TNet (k=3): fused trunk+max kernel, tiny FC head in jnp.
    t3p = params["tnet3"]
    pooled3 = tnet3_trunk_pool(x_bf, t3p["c1"], t3p["c2"], t3p["c3"], tn)
    t3 = tnet_head(pooled3, t3p)                                  # (B, 3, 3)

    # Fold the 3x3 transform into conv1: (x @ T) @ W1 == x @ (T @ W1).
    w1, b1 = params["conv1"]
    w1p = jnp.einsum("bij,jk->bik", t3, w1).astype(jnp.bfloat16)  # (B, 3, 64)

    # conv1 + TNet(k=64) trunk + max in one fused kernel (conv1 output not materialized).
    t64p = params["tnet64"]
    pooled64 = conv1_tnet64_pool(x_bf, w1p, b1,
                                 t64p["c1"], t64p["c2"], t64p["c3"], tn)
    t64 = tnet_head(pooled64, t64p)                               # (B, 64, 64)

    # Fold the 64x64 feature transform into conv2; conv1 (recomputed) -> conv2 -> conv3 -> max.
    w2, b2 = params["conv2"]
    w2p = jnp.einsum("bij,jk->bik", t64, w2).astype(jnp.bfloat16)  # (B, 64, 128)
    w3, b3 = params["conv3"]
    return conv123_max_pool(x_bf, w1p, b1, w2p, b2, w3, b3, tn)   # (B, 1024)


if __name__ == "__main__":
    key = jax.random.PRNGKey(0)
    kx, kp = jax.random.split(key)
    B, N = 2, 16
    x = jax.random.normal(kx, (B, 3, N), jnp.float32)   # matches torch NCW input (B, 3, num_points)
    params = init_encoder_params(kp)
    out = pointnet_encoder(x, params)
    out = jax.block_until_ready(out)
    assert out.shape == (B, 1024), out.shape
    assert bool(jnp.all(jnp.isfinite(out)))
    print("KERNEL_OK")
</pallas_src>

<mosaic_0001>
module attributes {stable_mosaic.version = 11 : i64} {
  func.func @_tnet3_trunk_kernel(%arg0: i32, %arg1: i32, %arg2: memref<1x16x3xbf16, #tpu.memory_space<vmem>>, %arg3: memref<3x64xbf16, #tpu.memory_space<vmem>>, %arg4: memref<1x64xf32, #tpu.memory_space<vmem>>, %arg5: memref<64x128xbf16, #tpu.memory_space<vmem>>, %arg6: memref<1x128xf32, #tpu.memory_space<vmem>>, %arg7: memref<128x1024xbf16, #tpu.memory_space<vmem>>, %arg8: memref<1x1024xf32, #tpu.memory_space<vmem>>, %arg9: memref<1x1x1024xf32, #tpu.memory_space<vmem>>, %arg10: memref<8x1024xf32, #tpu.memory_space<vmem>>) attributes {dimension_semantics = [#tpu.dimension_semantics<parallel>, #tpu.dimension_semantics<arbitrary>], iteration_bounds = array<i64: 2, 1>, scalar_prefetch = 0 : i64, scratch_operands = 1 : i64, tpu.core_type = #tpu.core_type<tc>, window_params = [{transform_indices = @transform_0, window_bounds = array<i64: 1, 16, 3>}, {pipeline_mode = #tpu.pipeline_mode<synchronous>, transform_indices = @transform_1, window_bounds = array<i64: 3, 64>}, {pipeline_mode = #tpu.pipeline_mode<synchronous>, transform_indices = @transform_2, window_bounds = array<i64: 1, 64>}, {pipeline_mode = #tpu.pipeline_mode<synchronous>, transform_indices = @transform_3, window_bounds = array<i64: 64, 128>}, {pipeline_mode = #tpu.pipeline_mode<synchronous>, transform_indices = @transform_4, window_bounds = array<i64: 1, 128>}, {pipeline_mode = #tpu.pipeline_mode<synchronous>, transform_indices = @transform_5, window_bounds = array<i64: 128, 1024>}, {pipeline_mode = #tpu.pipeline_mode<synchronous>, transform_indices = @transform_6, window_bounds = array<i64: 1, 1024>}, {transform_indices = @transform_7, window_bounds = array<i64: 1, 1, 1024>}]} {
    %c0_i32 = arith.constant 0 : i32
    %0 = arith.cmpi eq, %arg1, %c0_i32 : i32
    %1 = arith.extui %0 : i1 to i32
    %c0_i32_0 = arith.constant 0 : i32
    %2 = arith.cmpi ne, %1, %c0_i32_0 : i32
    scf.if %2 {
      %cst_24 = arith.constant 0xFF800000 : f32
      %31 = vector.broadcast %cst_24 : f32 to vector<8x1024xf32>
      %c0_25 = arith.constant 0 : index
      %c0_26 = arith.constant 0 : index
      %32 = vector.load %arg10[%c0_25, %c0_26] : memref<8x1024xf32, #tpu.memory_space<vmem>>, vector<8x1024xf32>
      tpu.vector_store %arg10[%c0_25, %c0_26], %31 {strides = array<i32>} : memref<8x1024xf32, #tpu.memory_space<vmem>>, vector<8x1024xf32>,
    } else {
    }
    %c0 = arith.constant 0 : index
    %c0_1 = arith.constant 0 : index
    %c0_2 = arith.constant 0 : index
    %3 = vector.load %arg2[%c0, %c0_1, %c0_2] : memref<1x16x3xbf16, #tpu.memory_space<vmem>>, vector<1x16x3xbf16>
    %4 = vector.shape_cast %3 : vector<1x16x3xbf16> to vector<16x3xbf16>
    %c0_3 = arith.constant 0 : index
    %c0_4 = arith.constant 0 : index
    %5 = vector.load %arg3[%c0_3, %c0_4] : memref<3x64xbf16, #tpu.memory_space<vmem>>, vector<3x64xbf16>
    %cst = arith.constant dense<0.000000e+00> : vector<16x64xf32>
    %6 = tpu.matmul %4, %5, %cst {dimension_numbers = #tpu.dot_dimension_numbers<[1], [0], [0], [1], [0, 0, 1, 1], [], []>} : vector<16x3xbf16>, vector<3x64xbf16>, vector<16x64xf32> -> vector<16x64xf32>
    %c0_5 = arith.constant 0 : index
    %c0_6 = arith.constant 0 : index
    %7 = vector.load %arg4[%c0_5, %c0_6] : memref<1x64xf32, #tpu.memory_space<vmem>>, vector<1x64xf32>
    %8 = vector.broadcast %7 : vector<1x64xf32> to vector<16x64xf32>
    %9 = arith.addf %6, %8 : vector<16x64xf32>
    %cst_7 = arith.constant 0.000000e+00 : f32
    %10 = vector.broadcast %cst_7 : f32 to vector<16x64xf32>
    %11 = arith.maximumf %9, %10 : vector<16x64xf32>
    %12 = arith.truncf %11 : vector<16x64xf32> to vector<16x64xbf16>
    %c0_8 = arith.constant 0 : index
    %c0_9 = arith.constant 0 : index
    %13 = vector.load %arg5[%c0_8, %c0_9] : memref<64x128xbf16, #tpu.memory_space<vmem>>, vector<64x128xbf16>
    %cst_10 = arith.constant dense<0.000000e+00> : vector<16x128xf32>
    %14 = tpu.matmul %12, %13, %cst_10 {dimension_numbers = #tpu.dot_dimension_numbers<[1], [0], [0], [1], [0, 0, 1, 1], [], []>} : vector<16x64xbf16>, vector<64x128xbf16>, vector<16x128xf32> -> vector<16x128xf32>
    %c0_11 = arith.constant 0 : index
    %c0_12 = arith.constant 0 : index
    %15 = vector.load %arg6[%c0_11, %c0_12] : memref<1x128xf32, #tpu.memory_space<vmem>>, vector<1x128xf32>
    %16 = vector.broadcast %15 : vector<1x128xf32> to vector<16x128xf32>
    %17 = arith.addf %14, %16 : vector<16x128xf32>
    %cst_13 = arith.constant 0.000000e+00 : f32
    %18 = vector.broadcast %cst_13 : f32 to vector<16x128xf32>
    %19 = arith.maximumf %17, %18 : vector<16x128xf32>
    %20 = arith.truncf %19 : vector<16x128xf32> to vector<16x128xbf16>
    %c0_14 = arith.constant 0 : index
    %c0_15 = arith.constant 0 : index
    %21 = vector.load %arg7[%c0_14, %c0_15] : memref<128x1024xbf16, #tpu.memory_space<vmem>>, vector<128x1024xbf16>
    %cst_16 = arith.constant dense<0.000000e+00> : vector<16x1024xf32>
    %22 = tpu.matmul %20, %21, %cst_16 {dimension_numbers = #tpu.dot_dimension_numbers<[1], [0], [0], [1], [0, 0, 1, 1], [], []>} : vector<16x128xbf16>, vector<128x1024xbf16>, vector<16x1024xf32> -> vector<16x1024xf32>
    %c0_17 = arith.constant 0 : index
    %c0_18 = arith.constant 0 : index
    %23 = vector.load %arg10[%c0_17, %c0_18] : memref<8x1024xf32, #tpu.memory_space<vmem>>, vector<8x1024xf32>
    %24 = vector.shape_cast %22 : vector<16x1024xf32> to vector<2x8x1024xf32>
    %cst_19 = arith.constant dense<0xFF800000> : vector<8x1024xf32>
    %25 = vector.multi_reduction <maximumf>, %24, %cst_19 [0] : vector<2x8x1024xf32> to vector<8x1024xf32>
    %26 = arith.maximumf %23, %25 : vector<8x1024xf32>
    %c0_20 = arith.constant 0 : index
    %c0_21 = arith.constant 0 : index
    %27 = vector.load %arg10[%c0_20, %c0_21] : memref<8x1024xf32, #tpu.memory_space<vmem>>, vector<8x1024xf32>
    tpu.vector_store %arg10[%c0_20, %c0_21], %26 {strides = array<i32>} : memref<8x1024xf32, #tpu.memory_space<vmem>>, vector<8x1024xf32>,
    %c0_i32_22 = arith.constant 0 : i32
    %28 = arith.cmpi eq, %arg1, %c0_i32_22 : i32
    %29 = arith.extui %28 : i1 to i32
    %c0_i32_23 = arith.constant 0 : i32
    %30 = arith.cmpi ne, %29, %c0_i32_23 : i32
    scf.if %30 {
      %c0_24 = arith.constant 0 : index
      %c0_25 = arith.constant 0 : index
      %31 = vector.load %arg10[%c0_24, %c0_25] : memref<8x1024xf32, #tpu.memory_space<vmem>>, vector<8x1024xf32>
      %cst_26 = arith.constant dense<0xFF800000> : vector<1024xf32>
      %32 = vector.multi_reduction <maximumf>, %31, %cst_26 [0] : vector<8x1024xf32> to vector<1024xf32>
      %33 = vector.shape_cast %32 : vector<1024xf32> to vector<1x1024xf32>
      %c0_27 = arith.constant 0 : index
      %c0_28 = arith.constant 0 : index
      %34 = vector.load %arg8[%c0_27, %c0_28] : memref<1x1024xf32, #tpu.memory_space<vmem>>, vector<1x1024xf32>
      %35 = arith.addf %33, %34 : vector<1x1024xf32>
      %cst_29 = arith.constant 0.000000e+00 : f32
      %36 = vector.broadcast %cst_29 : f32 to vector<1x1024xf32>
      %37 = arith.maximumf %35, %36 : vector<1x1024xf32>
      %c0_30 = arith.constant 0 : index
      %c0_31 = arith.constant 0 : index
      %c0_32 = arith.constant 0 : index
      %38 = vector.load %arg9[%c0_30, %c0_31, %c0_32] : memref<1x1x1024xf32, #tpu.memory_space<vmem>>, vector<1x1x1024xf32>
      %39 = vector.shape_cast %38 : vector<1x1x1024xf32> to vector<1x1024xf32>
      %40 = vector.shape_cast %37 : vector<1x1024xf32> to vector<1x1x1024xf32>
      tpu.vector_store %arg9[%c0_30, %c0_31, %c0_32], %40 {strides = array<i32>} : memref<1x1x1024xf32, #tpu.memory_space<vmem>>, vector<1x1x1024xf32>,
    } else {
    }
    return
  }
  func.func @transform_0(%arg0: i32, %arg1: i32) -> (i32, i32, i32) {
    %c0_i32 = arith.constant 0 : i32
    %c0_i32_0 = arith.constant 0 : i32
    return %arg0, %arg1, %c0_i32 : i32, i32, i32
  }
  func.func @transform_1(%arg0: i32, %arg1: i32) -> (i32, i32) {
    %c0_i32 = arith.constant 0 : i32
    %c0_i32_0 = arith.constant 0 : i32
    %c0_i32_1 = arith.constant 0 : i32
    return %c0_i32, %c0_i32_0 : i32, i32
  }
  func.func @transform_2(%arg0: i32, %arg1: i32) -> (i32, i32) {
    %c0_i32 = arith.constant 0 : i32
    %c0_i32_0 = arith.constant 0 : i32
    %c0_i32_1 = arith.constant 0 : i32
    return %c0_i32, %c0_i32_0 : i32, i32
  }
  func.func @transform_3(%arg0: i32, %arg1: i32) -> (i32, i32) {
    %c0_i32 = arith.constant 0 : i32
    %c0_i32_0 = arith.constant 0 : i32
    %c0_i32_1 = arith.constant 0 : i32
    return %c0_i32, %c0_i32_0 : i32, i32
  }
  func.func @transform_4(%arg0: i32, %arg1: i32) -> (i32, i32) {
    %c0_i32 = arith.constant 0 : i32
    %c0_i32_0 = arith.constant 0 : i32
    %c0_i32_1 = arith.constant 0 : i32
    return %c0_i32, %c0_i32_0 : i32, i32
  }
  func.func @transform_5(%arg0: i32, %arg1: i32) -> (i32, i32) {
    %c0_i32 = arith.constant 0 : i32
    %c0_i32_0 = arith.constant 0 : i32
    %c0_i32_1 = arith.constant 0 : i32
    return %c0_i32, %c0_i32_0 : i32, i32
  }
  func.func @transform_6(%arg0: i32, %arg1: i32) -> (i32, i32) {
    %c0_i32 = arith.constant 0 : i32
    %c0_i32_0 = arith.constant 0 : i32
    %c0_i32_1 = arith.constant 0 : i32
    return %c0_i32, %c0_i32_0 : i32, i32
  }
  func.func @transform_7(%arg0: i32, %arg1: i32) -> (i32, i32, i32) {
    %c0_i32 = arith.constant 0 : i32
    %c0_i32_0 = arith.constant 0 : i32
    %c0_i32_1 = arith.constant 0 : i32
    return %arg0, %c0_i32, %c0_i32_0 : i32, i32, i32
  }
}

</mosaic_0001>

<bundles_post_ra>
// kernel: tpu_custom_call.1
= control target key start
LH: loop header
LB: loop body
LE: loop exit
PB: predicated region body
PF: predicated region fallthrough
CT: control target
= control target key end

     0   :  { %s2010_s0 = inlined_call_operand.vmem [shape: bf16[2,16,3], index: 0, kind: input, shape index: {}]   ;;  %s2011_s1 = inlined_call_operand.vmem [shape: bf16[3,64], index: 1, kind: input, shape index: {}]   ;;  %s2012_s2 = inlined_call_operand.vmem [shape: f32[1,64], index: 2, kind: input, shape index: {}]   ;;  %s2013_s3 = inlined_call_operand.hbm [shape: bf16[64,128], index: 3, kind: input, shape index: {}]   ;;  %s2014_s4 = inlined_call_operand.vmem [shape: f32[1,128], index: 4, kind: input, shape index: {}]   ;;  %s2015_s5 = inlined_call_operand.hbm [shape: bf16[128,1024], index: 5, kind: input, shape index: {}]   ;;  %s2016_s6 = inlined_call_operand.vmem [shape: f32[1,1024], index: 6, kind: input, shape index: {}]   ;;  %s2017_s7 = inlined_call_operand.hbm [shape: f32[2,1,1024], index: 7, kind: output, shape index: {}]  }
   0x1   :  { %2018 = sst [smem:[#allocation12_spill]] %s2013_s3 }
   0x2   :  { %12 = vsyncpa [#allocation4], 0 }
   0x3   :  { %13 = vsyncpa [#allocation7], 0 }
   0x4   :  { %14 = vsyncpa [#allocation5], 0 }
   0x5   :  { %16 = vsyncpa [#allocation5 + $0x1], 0  ;;  %s1852_s24 = smov 0   ;;  %s1854_s25 = smov 0  }
   0x6   :  { %s1856_s26 = smov 0   ;;  %s1858_s27 = smov 0  }
   0x7   :  { %s1860_s28 = smov 0   ;;  %s1862_s29 = smov 0  }
   0x8 LB: > { %s1210_s30 = sadd.s32 4294967295, %s1803_s29   ;;  %s1211_s8 = sadd.s32 4294967294, %s1803_s29   ;;  %s1803_s29 = sphi %s1862_s29, %s22_s29   ;;  %s1799_s28 = sphi %s1860_s28, %s2028_s28   ;;  %s1795_s27 = sphi %s1858_s27, %s2027_s27   ;;  %s1791_s26 = sphi %s1856_s26, %s2026_s26   ;;  %s1787_s25 = sphi %s1854_s25, %s2025_s25   ;;  %s1783_s24 = sphi %s1852_s24, %s2024_s24  }
   0x9   : > { %s34_s9 = sadd.s32 1, %s1799_s28  ;;  %s195_s10 = sadd.s32 1, %s1791_s26 }
   0xa   : > { %p36_p0 = scmp.ge.s32.totalorder %s34_s9, 2  ;;  %p205_p1 = scmp.ne.s32.totalorder %s1791_s26, %s1787_s25 }
   0xb   : > { %p206_p2 = scmp.eq.s32.totalorder %s1210_s30, 1  ;;  %p211_p3 = scmp.ne.s32.totalorder %s1787_s25, %s1783_s24 }
   0xc   : > { %s2030_s9 = smov (%p36_p0, %s34_s9), 0  ;;  %p212_p5 = scmp.eq.s32.totalorder %s1211_s8, 1 }
   0xd   : > { %p1892_p4 = por %p206_p2, %p205_p1  ;;  %s192_s12 = ssub.s32 %s1799_s28, %s2030_s9 }
   0xe   : > { %p1212_p6 = scmp.ge.s32.totalorder %s1803_s29, 1  ;;  %p193_p7 = scmp.eq.s32.totalorder %s192_s12, 0 }
   0xf   : > { %p1899_p8 = por %p212_p5, %p211_p3  ;;  %p219_p9 = scmp.lt.s32.totalorder %s1803_s29, 3 }
  0x10   : > { %s1905_s14 = scalar_select %p193_p7, %s1791_s26, %s195_s10  }
  0x11   : > { %p1907_p10 = pnand %p1212_p6, %p219_p9  ;;  %p1911_p11 = scmp.eq.s32.totalorder %s1210_s30, 0 }
  0x12   : > { %s2023_s3 = sld [smem:[#allocation12_spill]]  ;;  %s1805_s20 = smov [#allocation3]  }
  0x13   : > { %p1584_p12 = pneg %p1907_p10  ;;  %s238_s21 = sshll.u32 %s1805_s20, 4  ;;  %s239_s21 = int_to_ptr.vmem [resolvable:$true] %s238_s21 }
  0x14   : > { %s253_s30 = sshll.u32 %s2015_s5, 4  ;;  %s1806_s8 = smov 64   ;;  %s254_s30 = int_to_ptr.hbm [resolvable:$true] %s253_s30 }
  0x15   : > { %p1585_p13 = pnand %p1911_p11, %p1584_p12  ;;  %s1807_s10 = smov 4  }
  0x16   : > { %s1808_s12 = smov [#allocation6]   ;;  %s1809_s18 = smov 512  }
  0x17   : > { %s255_s17 = sshll.u32 %s1808_s12, 4  ;;  %287 = sbr.rel (%p1907_p10) target bundleno = 501 (0x1f5), region = 48  ;;  %s256_s17 = int_to_ptr.vmem [resolvable:$true] %s255_s17 }
  0x18   : > { %s236_s19 = sshll.u32 %s2023_s3, 4  ;;  %s1810_s3 = smov 32   ;;  %s237_s19 = int_to_ptr.hbm [resolvable:$true] %s236_s19 }
  0x19   : > { %1587 = dma.hbm_to_vmem [thread:$0]  (!%p1585_p13), %s237_s19, 512, %s239_s21, [#allocation4], %s1806_s8, %s1806_s8, %s1807_s10  }
  0x1a   : > { %1590 = dma.hbm_to_vmem [thread:$0]  (!%p1585_p13), %s254_s30, 8192, %s256_s17, [#allocation7], %s1809_s18, %s1809_s18, %s1810_s3  }
  0x1c   : > { %1770 = dma.done.wait (%p1911_p11), [#allocation4], 512  }
  0x1d   : > { %1772 = vsyncadd (%p1911_p11), [#allocation4], 4294966784 }
  0x1e   : > { %1774 = dma.done.wait (%p1911_p11), [#allocation7], 8192  }
  0x1f   : > { %1776 = vsyncadd (%p1911_p11), [#allocation7], 4294959104  ;;  %vm368_vm0 = vcmask 1040384   ;;  %p330_p0 = scmp.lt.s32.totalorder %s1795_s27, 1  ;;  %vm369_vm1 = vcmask 1041408   ;;  %v1811_v0 = vmov 65535  }
  0x20   : > { %v370_v1 = vsel %vm368_vm0, 4294967295, %v1811_v0  ;;  %v354_v3 = vld [vmem:[%s2011_s1] sm:$0x3]  ;;  %vm364_vm2 = vcmask 23552   ;;  %v1509_v6 = vld [vmem:[#allocation3 + $0x18] sm:$0xff]  ;;  %v1508_v7 = vld [vmem:[#allocation3 + $0x10] sm:$0xff] }
  0x21   : > { %s331_s3 = scalar_select %p330_p0, %s1795_s27, 1  ;;  %v371_v2 = vsel %vm369_vm1, %v370_v1, 0  ;;  %436 = vmatpush.bf16.msra.mxu1 %v1509_v6  ;;  %v1507_v8 = vld [vmem:[#allocation3 + $0x8] sm:$0xff]  ;;  %v1506_v9 = vld [vmem:[#allocation3] sm:$0xff]  ;;  %vm428_vm3 = vcmask 523264   ;;  %vm1086_vm4 = vcmask 1042434  }
  0x22   : > { %v373_v4 = vand.u32 %v371_v2, %v354_v3  ;;  %v1470_v10 = vld [vmem:[#allocation6 + $0x1c0] sm:$0xf]  ;;  %v1566_v12 = vld [vmem:[#allocation6 + $0x1c4] sm:$0xf]  ;;  %v1478_v15 = vld [vmem:[#allocation6 + $0x1c8] sm:$0xf] }
  0x23   : > { %s1504_s15 = sshll.u32 %s331_s3, 3  ;;  %v1570_v11 = vld [vmem:[#allocation6 + $0x1dc] sm:$0xf0]  ;;  %v1472_v14 = vld [vmem:[#allocation6 + $0x1e0] sm:$0xf0]  ;;  %s326_s18 = sand.u32 1, %s1787_s25  }
  0x24   : > { %s337_s21 = scalar_lea.vmem %s2010_s0, %s1504_s15  ;;  %382 = vmatpush.bf16.msra.mxu0 %v373_v4  ;;  %v1471_v13 = vor.u32 %v1570_v11, %v1470_v10  ;;  %v1571_v16 = vld [vmem:[#allocation6 + $0x1e4] sm:$0xf0]  ;;  %v1475_v17 = vor.u32 %v1566_v12, %v1472_v14  ;;  %v1567_v19 = vld [vmem:[#allocation6 + $0x1cc] sm:$0xf]  ;;  %v1438_v21 = vld [vmem:[#allocation6 + $0x180] sm:$0xf] }
  0x25   : > { %v1505_v5 = vld [vmem:[%s337_s21] sm:$0xff]  ;;  %437 = vmatpush.bf16.msra.mxu1 %v1508_v7  ;;  %v1479_v18 = vor.u32 %v1571_v16, %v1478_v15  ;;  %v1480_v20 = vld [vmem:[#allocation6 + $0x1e8] sm:$0xf0]  ;;  %v1446_v28 = vld [vmem:[#allocation6 + $0x188] sm:$0xf]  ;;  %s1967_s3 = sshll.u32 %s326_s18, 3 }
  0x26   : > { %833 = vmatpush.bf16.msra.mxu2 %v1471_v13  ;;  %v1483_v22 = vor.u32 %v1567_v19, %v1480_v20  ;;  %v1562_v23 = vld [vmem:[#allocation6 + $0x19c] sm:$0xf0]  ;;  %v1558_v24 = vld [vmem:[#allocation6 + $0x184] sm:$0xf]  ;;  %847 = vmatpush.bf16.msra.mxu3 %v1475_v17  ;;  %v1563_v29 = vld [vmem:[#allocation6 + $0x1a4] sm:$0xf0] }
  0x27   : > { %1226 = vmatmul.msk.bf16.vlgmr.msra.gmra.mxu0 %vm364_vm2, %v1505_v5  ;;  %v1440_v25 = vld [vmem:[#allocation6 + $0x1a0] sm:$0xf0]  ;;  %v1439_v26 = vor.u32 %v1562_v23, %v1438_v21  ;;  %v1559_v30 = vld [vmem:[#allocation6 + $0x18c] sm:$0xf]  ;;  %v1447_v31 = vor.u32 %v1563_v29, %v1446_v28  ;;  %v1406_v33 = vld [vmem:[#allocation6 + $0x140] sm:$0xf] }
  0x28   : > { %861 = vmatpush.bf16.msrb.mxu0 %v1479_v18  ;;  %v1443_v27 = vor.u32 %v1558_v24, %v1440_v25  ;;  %v1448_v32 = vld [vmem:[#allocation6 + $0x1a8] sm:$0xf0]  ;;  %v1554_v34 = vld [vmem:[#allocation6 + $0x15c] sm:$0xf0]  ;;  %v1550_v36 = vld [vmem:[#allocation6 + $0x144] sm:$0xf] }
  0x29   : > { %438 = vmatpush.bf16.msra.mxu1 %v1507_v8  ;;  %v1451_v35 = vor.u32 %v1559_v30, %v1448_v32  ;;  %v1408_v37 = vld [vmem:[#allocation6 + $0x160] sm:$0xf0]  ;;  %v1414_v38 = vld [vmem:[#allocation6 + $0x148] sm:$0xf]  ;;  %v1407_v39 = vor.u32 %v1554_v34, %v1406_v33  ;;  %v1551_v41 = vld [vmem:[#allocation6 + $0x14c] sm:$0xf] }
  0x2a   : > { %834 = vmatpush.bf16.msra.mxu2 %v1439_v26  ;;  %v1555_v40 = vld [vmem:[#allocation6 + $0x164] sm:$0xf0]  ;;  %v1416_v42 = vld [vmem:[#allocation6 + $0x168] sm:$0xf0]  ;;  %848 = vmatpush.bf16.msra.mxu3 %v1443_v27  ;;  %v1411_v43 = vor.u32 %v1550_v36, %v1408_v37  ;;  %v1374_v45 = vld [vmem:[#allocation6 + $0x100] sm:$0xf] }
  0x2b   : > { %v1415_v44 = vor.u32 %v1555_v40, %v1414_v38  ;;  %v1546_v46 = vld [vmem:[#allocation6 + $0x11c] sm:$0xf0]  ;;  %v1542_v47 = vld [vmem:[#allocation6 + $0x104] sm:$0xf]  ;;  %v1419_v48 = vor.u32 %v1551_v41, %v1416_v42  ;;  %v1382_v50 = vld [vmem:[#allocation6 + $0x108] sm:$0xf] }
  0x2c   : > { %862 = vmatpush.bf16.msrb.mxu0 %v1447_v31  ;;  %v1376_v49 = vld [vmem:[#allocation6 + $0x120] sm:$0xf0]  ;;  %v1547_v51 = vld [vmem:[#allocation6 + $0x124] sm:$0xf0]  ;;  %v1543_v52 = vld [vmem:[#allocation6 + $0x10c] sm:$0xf]  ;;  %v1375_v54 = vor.u32 %v1546_v46, %v1374_v45 }
  0x2d   : > { %439 = vmatpush.bf16.msra.mxu1 %v1506_v9  ;;  %v1384_v53 = vld [vmem:[#allocation6 + $0x128] sm:$0xf0]  ;;  %v1379_v55 = vor.u32 %v1542_v47, %v1376_v49  ;;  %v1383_v56 = vor.u32 %v1547_v51, %v1382_v50  ;;  %v1342_v57 = vld [vmem:[#allocation6 + $0xc0] sm:$0xf]  ;;  %v1534_v59 = vld [vmem:[#allocation6 + $0xc4] sm:$0xf] }
  0x2e   : > { %835 = vmatpush.bf16.msra.mxu2 %v1407_v39  ;;  %849 = vmatpush.bf16.msra.mxu3 %v1411_v43  ;;  %v1538_v58 = vld [vmem:[#allocation6 + $0xdc] sm:$0xf0]  ;;  %v1387_v60 = vor.u32 %v1543_v52, %v1384_v53  ;;  %v1344_v61 = vld [vmem:[#allocation6 + $0xe0] sm:$0xf0]  ;;  %v1350_v62 = vld [vmem:[#allocation6 + $0xc8] sm:$0xf] }
  0x2f   : > { %v1539_v63 = vld [vmem:[#allocation6 + $0xe4] sm:$0xf0]  ;;  %v1535_v0 = vld [vmem:[#allocation6 + $0xcc] sm:$0xf]  ;;  %v1343_v2 = vor.u32 %v1538_v58, %v1342_v57  ;;  %v1347_v3 = vor.u32 %v1534_v59, %v1344_v61  ;;  %v1310_v5 = vld [vmem:[#allocation6 + $0x80] sm:$0xf] }
  0x30   : > { %863 = vmatpush.bf16.msrb.mxu0 %v1415_v44  ;;  %v1352_v1 = vld [vmem:[#allocation6 + $0xe8] sm:$0xf0]  ;;  %v1351_v4 = vor.u32 %v1539_v63, %v1350_v62  ;;  %v1530_v6 = vld [vmem:[#allocation6 + $0x9c] sm:$0xf0]  ;;  %v1526_v7 = vld [vmem:[#allocation6 + $0x84] sm:$0xf] }
  0x31   : > { %875 = vmatpush.bf16.msrb.mxu1 %v1483_v22  ;;  %v1355_v9 = vor.u32 %v1535_v0, %v1352_v1  ;;  %v1312_v10 = vld [vmem:[#allocation6 + $0xa0] sm:$0xf0]  ;;  %v1318_v11 = vld [vmem:[#allocation6 + $0x88] sm:$0xf]  ;;  %v1527_v13 = vld [vmem:[#allocation6 + $0x8c] sm:$0xf]  ;;  %v1311_v16 = vor.u32 %v1530_v6, %v1310_v5 }
  0x32   : > { %836 = vmatpush.bf16.msra.mxu2 %v1375_v54  ;;  %850 = vmatpush.bf16.msra.mxu3 %v1379_v55  ;;  %v1531_v12 = vld [vmem:[#allocation6 + $0xa4] sm:$0xf0]  ;;  %v1320_v14 = vld [vmem:[#allocation6 + $0xa8] sm:$0xf0]  ;;  %v1655_v15 = vld [vmem:[%s2012_s2] ss:$0 sm:$0xff]  ;;  %v1315_v17 = vor.u32 %v1526_v7, %v1312_v10 }
  0x33   : > { %v1319_v18 = vor.u32 %v1531_v12, %v1318_v11  ;;  %v1278_v19 = vld [vmem:[#allocation6 + $0x40] sm:$0xf]  ;;  %v1518_v21 = vld [vmem:[#allocation6 + $0x44] sm:$0xf]  ;;  %v1323_v22 = vor.u32 %v1527_v13, %v1320_v14  ;;  %v1286_v24 = vld [vmem:[#allocation6 + $0x48] sm:$0xf] }
  0x34   : > { %864 = vmatpush.bf16.msrb.mxu0 %v1383_v56  ;;  %v1522_v20 = vld [vmem:[#allocation6 + $0x5c] sm:$0xf0]  ;;  %v1280_v23 = vld [vmem:[#allocation6 + $0x60] sm:$0xf0]  ;;  %v1523_v25 = vld [vmem:[#allocation6 + $0x64] sm:$0xf0] }
  0x35   : > { %876 = vmatpush.bf16.msrb.mxu1 %v1451_v35  ;;  %v1519_v26 = vld [vmem:[#allocation6 + $0x4c] sm:$0xf]  ;;  %v1279_v28 = vor.u32 %v1522_v20, %v1278_v19  ;;  %v1283_v30 = vor.u32 %v1518_v21, %v1280_v23  ;;  %v1287_v31 = vor.u32 %v1523_v25, %v1286_v24  ;;  %v1246_v32 = vld [vmem:[#allocation6] sm:$0xf]  ;;  %v1510_v36 = vld [vmem:[#allocation6 + $0x4] sm:$0xf] }
  0x36   : > { %837 = vmatpush.bf16.msra.mxu2 %v1343_v2  ;;  %851 = vmatpush.bf16.msra.mxu3 %v1347_v3  ;;  %v1288_v27 = vld [vmem:[#allocation6 + $0x68] sm:$0xf0]  ;;  %v1514_v33 = vld [vmem:[#allocation6 + $0x1c] sm:$0xf0]  ;;  %v1248_v37 = vld [vmem:[#allocation6 + $0x20] sm:$0xf0] }
  0x37   : > { %v1291_v35 = vor.u32 %v1519_v26, %v1288_v27  ;;  %v1254_v38 = vld [vmem:[#allocation6 + $0x8] sm:$0xf]  ;;  %v1511_v41 = vld [vmem:[#allocation6 + $0xc] sm:$0xf]  ;;  %v1247_v43 = vor.u32 %v1514_v33, %v1246_v32  ;;  %v1251_v46 = vor.u32 %v1510_v36, %v1248_v37  ;;  %v1486_v50 = vld [vmem:[#allocation6 + $0x1d0] sm:$0xf] }
  0x38   : > { %865 = vmatpush.bf16.msrb.mxu0 %v1351_v4  ;;  %v1515_v40 = vld [vmem:[#allocation6 + $0x24] sm:$0xf0]  ;;  %v1256_v42 = vld [vmem:[#allocation6 + $0x28] sm:$0xf0]  ;;  %v1572_v51 = vld [vmem:[#allocation6 + $0x1ec] sm:$0xf0] }
  0x39   : > { %877 = vmatpush.bf16.msrb.mxu1 %v1419_v48  ;;  %v1255_v47 = vor.u32 %v1515_v40, %v1254_v38  ;;  %v1259_v48 = vor.u32 %v1511_v41, %v1256_v42  ;;  %v1568_v52 = vld [vmem:[#allocation6 + $0x1d4] sm:$0xf]  ;;  %v1487_v53 = vor.u32 %v1572_v51, %v1486_v50  ;;  %v1494_v55 = vld [vmem:[#allocation6 + $0x1d8] sm:$0xf]  ;;  %v1569_v59 = vld [vmem:[#allocation6 + $0x1dc] sm:$0xf] }
  0x3a   : > { %838 = vmatpush.bf16.msra.mxu2 %v1311_v16  ;;  %852 = vmatpush.bf16.msra.mxu3 %v1315_v17  ;;  %v1488_v54 = vld [vmem:[#allocation6 + $0x1f0] sm:$0xf0]  ;;  %v1573_v56 = vld [vmem:[#allocation6 + $0x1f4] sm:$0xf0]  ;;  %v1454_v62 = vld [vmem:[#allocation6 + $0x190] sm:$0xf] }
  0x3b   : > { %v1491_v57 = vor.u32 %v1568_v52, %v1488_v54  ;;  %v1495_v58 = vor.u32 %v1573_v56, %v1494_v55  ;;  %v1564_v63 = vld [vmem:[#allocation6 + $0x1ac] sm:$0xf0]  ;;  %v1560_v0 = vld [vmem:[#allocation6 + $0x194] sm:$0xf]  ;;  %v1462_v3 = vld [vmem:[#allocation6 + $0x198] sm:$0xf] }
  0x3c   : > { %866 = vmatpush.bf16.msrb.mxu0 %v1319_v18  ;;  %v1455_v1 = vor.u32 %v1564_v63, %v1454_v62  ;;  %v1456_v2 = vld [vmem:[#allocation6 + $0x1b0] sm:$0xf0]  ;;  %v1565_v4 = vld [vmem:[#allocation6 + $0x1b4] sm:$0xf0]  ;;  %v1561_v7 = vld [vmem:[#allocation6 + $0x19c] sm:$0xf] }
  0x3d   : > { %878 = vmatpush.bf16.msrb.mxu1 %v1387_v60  ;;  %v1496_v60 = vld [vmem:[#allocation6 + $0x1f8] sm:$0xf0]  ;;  %v1459_v5 = vor.u32 %v1560_v0, %v1456_v2  ;;  %v1463_v6 = vor.u32 %v1565_v4, %v1462_v3  ;;  %v1422_v10 = vld [vmem:[#allocation6 + $0x150] sm:$0xf]  ;;  %v1552_v12 = vld [vmem:[#allocation6 + $0x154] sm:$0xf] }
  0x3e   : > { %839 = vmatpush.bf16.msra.mxu2 %v1279_v28  ;;  %853 = vmatpush.bf16.msra.mxu3 %v1283_v30  ;;  %v1499_v61 = vor.u32 %v1569_v59, %v1496_v60  ;;  %v1556_v11 = vld [vmem:[#allocation6 + $0x16c] sm:$0xf0]  ;;  %v1424_v14 = vld [vmem:[#allocation6 + $0x170] sm:$0xf0]  ;;  %v1557_v16 = vld [vmem:[#allocation6 + $0x174] sm:$0xf0] }
  0x3f   : > { %v1423_v13 = vor.u32 %v1556_v11, %v1422_v10  ;;  %v1427_v17 = vor.u32 %v1552_v12, %v1424_v14  ;;  %v1553_v19 = vld [vmem:[#allocation6 + $0x15c] sm:$0xf]  ;;  %v1548_v23 = vld [vmem:[#allocation6 + $0x12c] sm:$0xf0]  ;;  %v1544_v24 = vld [vmem:[#allocation6 + $0x114] sm:$0xf] }
  0x40   : > { %867 = vmatpush.bf16.msrb.mxu0 %v1287_v31  ;;  %v1432_v20 = vld [vmem:[#allocation6 + $0x178] sm:$0xf0]  ;;  %v1392_v26 = vld [vmem:[#allocation6 + $0x130] sm:$0xf0]  ;;  %v1398_v27 = vld [vmem:[#allocation6 + $0x118] sm:$0xf] }
  0x41   : > { %879 = vmatpush.bf16.msrb.mxu1 %v1355_v9  ;;  %v1435_v21 = vor.u32 %v1553_v19, %v1432_v20  ;;  %v1549_v28 = vld [vmem:[#allocation6 + $0x134] sm:$0xf0]  ;;  %v1545_v31 = vld [vmem:[#allocation6 + $0x11c] sm:$0xf]  ;;  %v1536_v36 = vld [vmem:[#allocation6 + $0xd4] sm:$0xf] }
  0x42   : > { %840 = vmatpush.bf16.msra.mxu2 %v1247_v43  ;;  %854 = vmatpush.bf16.msra.mxu3 %v1251_v46  ;;  %v1399_v30 = vor.u32 %v1549_v28, %v1398_v27  ;;  %v1400_v32 = vld [vmem:[#allocation6 + $0x138] sm:$0xf0]  ;;  %v1360_v38 = vld [vmem:[#allocation6 + $0xf0] sm:$0xf0]  ;;  %v1541_v40 = vld [vmem:[#allocation6 + $0xf4] sm:$0xf0] }
  0x43   : > { %v1403_v33 = vor.u32 %v1545_v31, %v1400_v32  ;;  %v1363_v41 = vor.u32 %v1536_v36, %v1360_v38  ;;  %v1537_v43 = vld [vmem:[#allocation6 + $0xdc] sm:$0xf]  ;;  %v1334_v52 = vld [vmem:[#allocation6 + $0x98] sm:$0xf]  ;;  %v1520_v60 = vld [vmem:[#allocation6 + $0x54] sm:$0xf] }
  0x44   : > { %868 = vmatpush.bf16.msrb.mxu0 %v1255_v47  ;;  %v1532_v47 = vld [vmem:[#allocation6 + $0xac] sm:$0xf0]  ;;  %v1529_v54 = vld [vmem:[#allocation6 + $0x9c] sm:$0xf]  ;;  %v1302_v62 = vld [vmem:[#allocation6 + $0x58] sm:$0xf] }
  0x45   : > { %880 = vmatpush.bf16.msrb.mxu1 %v1323_v22  ;;  %v1390_v22 = vld [vmem:[#allocation6 + $0x110] sm:$0xf]  ;;  %v1336_v56 = vld [vmem:[#allocation6 + $0xb8] sm:$0xf0]  ;;  %v1525_v0 = vld [vmem:[#allocation6 + $0x74] sm:$0xf0] }
  0x46   : > { %889 = vmatpush.bf16.msrb.mxu2 %v1487_v53  ;;  %903 = vmatpush.bf16.msrb.mxu3 %v1491_v57  ;;  %v1391_v25 = vor.u32 %v1548_v23, %v1390_v22  ;;  %v1533_v53 = vld [vmem:[#allocation6 + $0xb4] sm:$0xf0]  ;;  %v1294_v57 = vld [vmem:[#allocation6 + $0x50] sm:$0xf]  ;;  %v1339_v59 = vor.u32 %v1529_v54, %v1336_v56  ;;  %v1304_v2 = vld [vmem:[#allocation6 + $0x78] sm:$0xf0]  ;;  %v1303_v4 = vor.u32 %v1525_v0, %v1302_v62 }
  0x47   : > { %v1335_v55 = vor.u32 %v1533_v53, %v1334_v52  ;;  %v1270_v10 = vld [vmem:[#allocation6 + $0x18] sm:$0xf]  ;;  %v1513_v12 = vld [vmem:[#allocation6 + $0x1c] sm:$0xf]  ;;  %v1656_v19 = vld [vmem:[%s2014_s4] ss:$0 sm:$0xff] }
  0x48   : > { %917 = vmatpush.bf16.msra.mxu0 %v1495_v58  ;;  %v1524_v58 = vld [vmem:[#allocation6 + $0x6c] sm:$0xf0]  ;;  %v1517_v11 = vld [vmem:[#allocation6 + $0x34] sm:$0xf0]  ;;  %s1501_s15 = sshll.u32 %s1795_s27, 3  ;;  %vm1089_vm5 = vcmask 1044484  }
  0x49   : > { %881 = vmatpush.bf16.msrb.mxu1 %v1291_v35  ;;  %v1540_v35 = vld [vmem:[#allocation6 + $0xec] sm:$0xf0]  ;;  %v1295_v63 = vor.u32 %v1524_v58, %v1294_v57  ;;  %s1110_s21 = scalar_lea.hbm %s2017_s7, %s1501_s15  ;;  %vm1091_vm6 = vcmask 1046534   ;;  %vm1093_vm7 = vcmask 1045508   ;;  %s328_s27 = scalar_lea.vmem [#allocation8], %s1967_s3  ;;  %vm1095_vm8 = vcmask 1043456  }
  0x4a   : > { %890 = vmatpush.bf16.msrb.mxu2 %v1455_v1  ;;  %904 = vmatpush.bf16.msrb.mxu3 %v1459_v5  ;;  %v1521_v1 = vld [vmem:[#allocation6 + $0x5c] sm:$0xf]  ;;  %v1262_v5 = vld [vmem:[#allocation6 + $0x10] sm:$0xf]  ;;  %s1112_s22 = sshll.u32 %s328_s27, 4  ;;  %s1114_s23 = sshll.u32 %s1110_s21, 4  ;;  %s1113_s22 = int_to_ptr.vmem [resolvable:$true] %s1112_s22  ;;  %s1115_s23 = int_to_ptr.hbm [resolvable:$true] %s1114_s23 }
  0x4b   : > { %s1100_s16 = scalar_lea.sflag [#allocation5], %s326_s18  ;;  %s1731_s30 = sshra.s32 %s1115_s23, 4  ;;  %s1732_s30 = int_to_ptr.hbm [resolvable:$true] %s1731_s30 }
  0x4c   : > { %918 = vmatpush.bf16.msra.mxu0 %v1463_v6  ;;  %v1516_v6 = vld [vmem:[#allocation6 + $0x2c] sm:$0xf0]  ;;  %s1733_s8 = scalar_lea.hbm %s1732_s30, 8  ;;  %s1737_s17 = scalar_lea.hbm %s2017_s7, 16 }
  0x4d   : > { %882 = vmatpush.bf16.msrb.mxu1 %v1259_v48  ;;  %v1528_v48 = vld [vmem:[#allocation6 + $0x94] sm:$0xf]  ;;  %v1263_v14 = vor.u32 %v1516_v6, %v1262_v5  ;;  %p1734_p1 = scmp.ne.s32.totalorder %s1732_s30, %s1733_s8  ;;  %p1738_p5 = scmp.lt.s32.totalorder %s1732_s30, %s2017_s7 }
  0x4e   : > { %891 = vmatpush.bf16.msrb.mxu2 %v1423_v13  ;;  %905 = vmatpush.bf16.msrb.mxu3 %v1427_v17  ;;  %v1272_v13 = vld [vmem:[#allocation6 + $0x38] sm:$0xf0]  ;;  %p1739_p6 = scmp.lt.s32.totalorder %s1737_s17, %s1733_s8 }
  0x4f   : > { %v1275_v17 = vor.u32 %v1513_v12, %v1272_v13  ;;  %p1735_p2 = pnand %p1734_p1, %p1892_p4 }
  0x50   : > { %p1740_p7 = por %p1739_p6, %p1738_p5 }
  0x51   : > { %p1736_p3 = pneg %p1735_p2 }
  0x52   : > { %892 = vmatpush.bf16.msrb.mxu2 %v1391_v25 }
  0x53   : > { %p1741_p9 = pnand %p1740_p7, %p1736_p3 }
  0xa4   : > { %v384_v8 = vpop.f32.mrf.mxu0 }
  0xa5   : > { %v385_v29 = vadd.f32 %v1655_v15, %v384_v8  ;;  %v1464_v8 = vld [vmem:[#allocation6 + $0x1b8] sm:$0xf0] }
  0xa6   : > { %v1467_v9 = vor.u32 %v1561_v7, %v1464_v8  ;;  %v1512_v7 = vld [vmem:[#allocation6 + $0x14] sm:$0xf]  ;;  %v1307_v8 = vor.u32 %v1521_v1, %v1304_v2 }
  0xa7   : > { %v389_v44 = vmax.f32 %v385_v29, 0.0  ;;  %v1395_v29 = vor.u32 %v1544_v24, %v1392_v26 }
  0xa9   : > { %906 = vmatpush.bf16.msrb.mxu3 %v1395_v29 }
  0xac   : > { %v386_v34 = vpop.f32.mrf.mxu0 }
  0xad   : > { %v387_v39 = vadd.f32 %v1655_v15, %v386_v34  ;;  %v1430_v15 = vld [vmem:[#allocation6 + $0x158] sm:$0xf]  ;;  %v1358_v34 = vld [vmem:[#allocation6 + $0xd0] sm:$0xf]  ;;  %907 = vmatpush.bf16.msrb.mxu3 %v1363_v41 }
  0xae   : > { %v1431_v18 = vor.u32 %v1557_v16, %v1430_v15  ;;  %v1359_v37 = vor.u32 %v1540_v35, %v1358_v34  ;;  %v1271_v16 = vor.u32 %v1517_v11, %v1270_v10 }
  0xaf   : > { %v390_v45 = vmax.f32 %v387_v39, 0.0  ;;  %v1366_v39 = vld [vmem:[#allocation6 + $0xd8] sm:$0xf] }
  0xb0   : > { %919 = vmatpush.bf16.msra.mxu0 %v1431_v18  ;;  %v1367_v42 = vor.u32 %v1541_v40, %v1366_v39  ;;  %893 = vmatpush.bf16.msrb.mxu2 %v1359_v37 }
  0xb1   : > { %v391_v49 = vpack.c.bf16 %v390_v45, %v389_v44  ;;  %v1368_v44 = vld [vmem:[#allocation6 + $0xf8] sm:$0xf0]  ;;  %v1326_v45 = vld [vmem:[#allocation6 + $0x90] sm:$0xf] }
  0xb2   : > { %v1371_v46 = vor.u32 %v1537_v43, %v1368_v44  ;;  %v1327_v50 = vor.u32 %v1532_v47, %v1326_v45 }
  0xb3   : > { %1243 = vmatmul.msk.bf16.vlgmr.msra.gmra.mxu1 %vm428_vm3, %v391_v49  ;;  %v1328_v49 = vld [vmem:[#allocation6 + $0xb0] sm:$0xf0] }
  0xb4   : > { %931 = vmatpush.bf16.msra.mxu1 %v1499_v61  ;;  %920 = vmatpush.bf16.msra.mxu0 %v1399_v30  ;;  %v1331_v51 = vor.u32 %v1528_v48, %v1328_v49  ;;  %v1296_v61 = vld [vmem:[#allocation6 + $0x70] sm:$0xf0] }
  0xb5   : > { %894 = vmatpush.bf16.msrb.mxu2 %v1327_v50  ;;  %v1299_v3 = vor.u32 %v1520_v60, %v1296_v61  ;;  %v1954_v61 = vld [vmem:[%s2016_s6] sm:$0xff] }
  0xb6   : > { %908 = vmatpush.bf16.msrb.mxu3 %v1331_v51  ;;  %v1041_v11 = vperm.slane %v1954_v61, 3  ;;  %v1039_v12 = vperm.slane %v1954_v61, 1 }
  0xb8   : > { %932 = vmatpush.bf16.msra.mxu1 %v1467_v9  ;;  %921 = vmatpush.bf16.msra.mxu0 %v1367_v42  ;;  %v1264_v9 = vld [vmem:[#allocation6 + $0x30] sm:$0xf0] }
  0xb9   : > { %895 = vmatpush.bf16.msrb.mxu2 %v1295_v63  ;;  %v1267_v15 = vor.u32 %v1512_v7, %v1264_v9 }
  0xba   : > { %909 = vmatpush.bf16.msrb.mxu3 %v1299_v3 }
  0xbc   : > { %933 = vmatpush.bf16.msra.mxu1 %v1435_v21  ;;  %922 = vmatpush.bf16.msra.mxu0 %v1335_v55 }
  0xbd   : > { %896 = vmatpush.bf16.msrb.mxu2 %v1263_v14 }
  0xbe   : > { %910 = vmatpush.bf16.msrb.mxu3 %v1267_v15 }
  0xc0   : > { %934 = vmatpush.bf16.msra.mxu1 %v1403_v33  ;;  %923 = vmatpush.bf16.msra.mxu0 %v1303_v4 }
  0xc4   : > { %935 = vmatpush.bf16.msra.mxu1 %v1371_v46  ;;  %924 = vmatpush.bf16.msra.mxu0 %v1271_v16 }
  0xc8   : > { %936 = vmatpush.bf16.msra.mxu1 %v1339_v59 }
  0xcc   : > { %937 = vmatpush.bf16.msra.mxu1 %v1307_v8  ;;  %v1040_v8 = vperm.slane %v1954_v61, 2 }
  0xd0   : > { %938 = vmatpush.bf16.msra.mxu1 %v1275_v17 }
 0x130   : > { %v441_v18 = vpop.f32.mrf.mxu1 }
 0x131   : > { %v442_v20 = vadd.f32 %v1656_v19, %v441_v18 }
 0x133   : > { %v446_v23 = vmax.f32 %v442_v20, 0.0 }
 0x138   : > { %v443_v21 = vpop.f32.mrf.mxu1 }
 0x139   : > { %v444_v22 = vadd.f32 %v1656_v19, %v443_v21 }
 0x13b   : > { %v447_v24 = vmax.f32 %v444_v22, 0.0 }
 0x13d   : > { %v448_v25 = vpack.c.bf16 %v447_v24, %v446_v23  ;;  %v1038_v23 = vperm.slane %v1954_v61, 0 }
 0x13f   : > { %841 = vmatmul.bf16.vlgmr.msra.gmra.mxu2 %v448_v25  ;;  %855 = vmatmul.bf16.vlgmr.msra.gmra.mxu3 %v448_v25 }
 0x140   : > { %869 = vmatmul.bf16.vlgmr.msrb.gmra.mxu0 %v448_v25  ;;  %883 = vmatmul.bf16.vlgmr.msrb.gmra.mxu1 %v448_v25 }
 0x14f   : > { %897 = vmatmul.bf16.vlgmr.msrb.gmra.mxu2 %v448_v25  ;;  %911 = vmatmul.bf16.vlgmr.msrb.gmra.mxu3 %v448_v25 }
 0x150   : > { %925 = vmatmul.bf16.vlgmr.msra.gmra.mxu0 %v448_v25  ;;  %939 = vmatmul.bf16.vlgmr.msra.gmra.mxu1 %v448_v25 }
 0x1bd   : > { %v870_v26 = vpop.f32.mrf.mxu0  ;;  %v884_v27 = vpop.f32.mrf.mxu1 }
 0x1c2   : > { %v842_v28 = vpop.f32.mrf.mxu2  ;;  %v856_v29 = vpop.f32.mrf.mxu3 }
 0x1c5   : > { %v872_v30 = vpop.f32.mrf.mxu0  ;;  %v886_v31 = vpop.f32.mrf.mxu1 }
 0x1c6   : > { %v955_v32 = vmax.f32 %v870_v26, %v872_v30  ;;  %v956_v33 = vmax.f32 %v884_v27, %v886_v31  ;;  %v1044_v27 = vperm.slane %v1954_v61, 6 }
 0x1c8   : > { %v1000_v34 = vrot.slane %v955_v32, 4  ;;  %v1006_v35 = vrot.slane %v956_v33, 4 }
 0x1ca   : > { %v844_v36 = vpop.f32.mrf.mxu2  ;;  %v858_v37 = vpop.f32.mrf.mxu3  ;;  %v1001_v40 = vmax.f32 %v955_v32, %v1000_v34  ;;  %v1007_v44 = vmax.f32 %v956_v33, %v1006_v35 }
 0x1cb   : > { %v953_v38 = vmax.f32 %v842_v28, %v844_v36  ;;  %v954_v39 = vmax.f32 %v856_v29, %v858_v37  ;;  %v1045_v29 = vperm.slane %v1954_v61, 7 }
 0x1cc   : > { %v1002_v47 = vrot.slane %v1001_v40, 2  ;;  %v1008_v49 = vrot.slane %v1007_v44, 2 }
 0x1cd   : > { %v994_v41 = vrot.slane %v954_v39, 4  ;;  %v926_v42 = vpop.f32.mrf.mxu0  ;;  %v940_v43 = vpop.f32.mrf.mxu1  ;;  %v988_v45 = vrot.slane %v953_v38, 4 }
 0x1ce   : > { %v1003_v53 = vmax.f32 %v1001_v40, %v1002_v47  ;;  %v1009_v57 = vmax.f32 %v1007_v44, %v1008_v49 }
 0x1cf   : > { %v995_v46 = vmax.f32 %v954_v39, %v994_v41  ;;  %v989_v50 = vmax.f32 %v953_v38, %v988_v45 }
 0x1d0   : > { %v1004_v0 = vrot.slane %v1003_v53, 1  ;;  %v1010_v2 = vrot.slane %v1009_v57, 1 }
 0x1d1   : > { %v996_v48 = vrot.slane %v995_v46, 2  ;;  %v990_v58 = vrot.slane %v989_v50, 2 }
 0x1d2   : > { %v898_v51 = vpop.f32.mrf.mxu2  ;;  %v912_v52 = vpop.f32.mrf.mxu3  ;;  %v1005_v15 = vmax.f32 %v1003_v53, %v1004_v0  ;;  %v1011_v19 = vmax.f32 %v1009_v57, %v1010_v2 }
 0x1d3   : > { %v997_v54 = vmax.f32 %v995_v46, %v996_v48  ;;  %v991_v3 = vmax.f32 %v989_v50, %v990_v58  ;;  %v1043_v46 = vperm.slane %v1954_v61, 5 }
 0x1d4   : > { %v1056_v30 = vadd.f32 %v1040_v8, %v1005_v15  ;;  %v1057_v34 = vadd.f32 %v1041_v11, %v1011_v19 }
 0x1d5   : > { %v928_v55 = vpop.f32.mrf.mxu0  ;;  %v942_v56 = vpop.f32.mrf.mxu1  ;;  %v998_v1 = vrot.slane %v997_v54, 1  ;;  %v992_v20 = vrot.slane %v991_v3, 1 }
 0x1d6   : > { %v959_v59 = vmax.f32 %v926_v42, %v928_v55  ;;  %v960_v60 = vmax.f32 %v940_v43, %v942_v56  ;;  %v1042_v42 = vperm.slane %v1954_v61, 4  ;;  %v1064_v47 = vmax.f32 %v1056_v30, 0.0 }
 0x1d7   : > { %v999_v16 = vmax.f32 %v997_v54, %v998_v1  ;;  %v993_v35 = vmax.f32 %v991_v3, %v992_v20  ;;  %v1065_v48 = vmax.f32 %v1057_v34, 0.0 }
 0x1d8   : > { %v1024_v62 = vrot.slane %v959_v59, 4  ;;  %v1030_v63 = vrot.slane %v960_v60, 4  ;;  %v1079_v57 = vrot.slane %v1064_v47, 6 }
 0x1d9   : > { %v1055_v31 = vadd.f32 %v1039_v12, %v999_v16  ;;  %v1054_v49 = vadd.f32 %v1038_v23, %v993_v35  ;;  %v1080_v58 = vrot.slane %v1065_v48, 5 }
 0x1da   : > { %v1025_v4 = vmax.f32 %v959_v59, %v1024_v62  ;;  %v1031_v5 = vmax.f32 %v960_v60, %v1030_v63  ;;  %v900_v6 = vpop.f32.mrf.mxu2  ;;  %v914_v7 = vpop.f32.mrf.mxu3 }
 0x1db   : > { %v957_v9 = vmax.f32 %v898_v51, %v900_v6  ;;  %v958_v10 = vmax.f32 %v912_v52, %v914_v7  ;;  %v1063_v43 = vmax.f32 %v1055_v31, 0.0  ;;  %v1062_v59 = vmax.f32 %v1054_v49, 0.0 }
 0x1dc   : > { %v1026_v13 = vrot.slane %v1025_v4, 2  ;;  %v1032_v14 = vrot.slane %v1031_v5, 2  ;;  %v1087_v3 = vsel %vm1086_vm4, %v1079_v57, %v1080_v58 }
 0x1dd   : > { %v1012_v17 = vrot.slane %v957_v9, 4  ;;  %v1018_v18 = vrot.slane %v958_v10, 4  ;;  %v1078_v54 = vrot.slane %v1063_v43, 7 }
 0x1de   : > { %v1027_v21 = vmax.f32 %v1025_v4, %v1026_v13  ;;  %v1033_v22 = vmax.f32 %v1031_v5, %v1032_v14 }
 0x1df   : > { %v1013_v24 = vmax.f32 %v957_v9, %v1012_v17  ;;  %v1019_v25 = vmax.f32 %v958_v10, %v1018_v18  ;;  %v1085_v2 = vsel %vm368_vm0, %v1062_v59, %v1078_v54 }
 0x1e0   : > { %v1028_v26 = vrot.slane %v1027_v21, 1  ;;  %v1034_v28 = vrot.slane %v1033_v22, 1  ;;  %v1088_v6 = vsel %vm369_vm1, %v1085_v2, %v1087_v3 }
 0x1e1   : > { %v1014_v32 = vrot.slane %v1013_v24, 2  ;;  %v1020_v33 = vrot.slane %v1019_v25, 2 }
 0x1e2   : > { %v1029_v36 = vmax.f32 %v1027_v21, %v1028_v26  ;;  %v1035_v37 = vmax.f32 %v1033_v22, %v1034_v28 }
 0x1e3   : > { %v1015_v38 = vmax.f32 %v1013_v24, %v1014_v32  ;;  %v1021_v39 = vmax.f32 %v1019_v25, %v1020_v33 }
 0x1e4   : > { %v1060_v40 = vadd.f32 %v1044_v27, %v1029_v36  ;;  %v1061_v41 = vadd.f32 %v1045_v29, %v1035_v37 }
 0x1e5   : > { %v1016_v44 = vrot.slane %v1015_v38, 1  ;;  %v1022_v45 = vrot.slane %v1021_v39, 1 }
 0x1e6   : > { %v1068_v50 = vmax.f32 %v1060_v40, 0.0  ;;  %v1069_v51 = vmax.f32 %v1061_v41, 0.0 }
 0x1e7   : > { %v1017_v52 = vmax.f32 %v1015_v38, %v1016_v44  ;;  %v1023_v53 = vmax.f32 %v1021_v39, %v1022_v45 }
 0x1e8   : > { %v1083_v60 = vrot.slane %v1068_v50, 2  ;;  %v1084_v61 = vrot.slane %v1069_v51, 1 }
 0x1e9   : > { %v1058_v55 = vadd.f32 %v1042_v42, %v1017_v52  ;;  %v1059_v56 = vadd.f32 %v1043_v46, %v1023_v53 }
 0x1ea   : > { %v1092_v5 = vsel %vm1091_vm6, %v1083_v60, %v1084_v61 }
 0x1eb   : > { %v1066_v62 = vmax.f32 %v1058_v55, 0.0  ;;  %v1067_v63 = vmax.f32 %v1059_v56, 0.0 }
 0x1ed   : > { %v1081_v0 = vrot.slane %v1066_v62, 4  ;;  %v1082_v1 = vrot.slane %v1067_v63, 3 }
 0x1ef   : > { %v1090_v4 = vsel %vm1089_vm5, %v1081_v0, %v1082_v1 }
 0x1f0   : > { %v1094_v7 = vsel %vm1093_vm7, %v1090_v4, %v1092_v5 }
 0x1f1   : > { %v1096_v8 = vsel %vm1095_vm8, %v1088_v6, %v1094_v7 }
 0x1f2   : > { %1098 = vst [vmem:[%s328_s27] sm:$0xff] %v1096_v8 }
 0x1f3   : > { %1744 = shalt.err (!%p1741_p9)
}
 0x1f4   : > { %1582 = dma.vmem_to_hbm [thread:$0]  (%p1892_p4), %s1113_s22, 128, %s1115_s23, %s1100_s16  }
 0x1f5 PF: > { %p1599_p10 = scmp.ge.s32.totalorder %s1803_s29, 2  ;;  %s1126_s18 = sand.u32 1, %s1783_s24  }
 0x1f6   : > { %s1127_s19 = scalar_lea.sflag [#allocation5], %s1126_s18 }
 0x1f7   : > { %p1592_p11 = pnand %p1599_p10, %p1899_p8 }
 0x1f9   : > { %p1593_p12 = pneg %p1592_p11 }
 0x1fb   : > { %1778 = dma.done.wait (%p1593_p12), %s1127_s19, 128  }
 0x1fc   : > { %1780 = vsyncadd (%p1593_p12), %s1127_s19, 4294967168  ;;  %s22_s29 = sadd.s32 1, %s1803_s29   ;;  %s2024_s24 = smov %s1787_s25 }
 0x1fd   : > { %p19_p13 = scmp.ge.s32.totalorder %s22_s29, 4   ;;  %s2025_s25 = smov %s1791_s26 }
 0x1fe   : > { %s2026_s26 = smov %s1905_s14  ;;  %s2027_s27 = smov %s1799_s28 }
 0x1ff   : > { %s2028_s28 = smov %s2030_s9  ;;  %21 = sbr.rel (!%p19_p13) target bundleno = 8 (0x8), region = 100 }
 0x204   :  { %1133 = vsyncpa [#allocation4], 1 }
 0x205   :  { %1135 = vsyncpa [#allocation4 + $0x1], 1 }
 0x206   :  { %1136 = vsyncpa [#allocation7], 1 }
 0x207   :  { %1137 = vsyncpa [#allocation5], 1 }
 0x208   :  { %1139 = vsyncpa [#allocation5 + $0x1], 1 }

</bundles_post_ra>
